<compile_context>
chip_gen: v7x
topology: tpu7x:2x2x1
jax: 0.10.0
libtpu: 0.0.40
codegen_flags: <defaults>
</compile_context>

<pallas_src>
import numpy as np
import jax
import jax.numpy as jnp
from jax.experimental import pallas as pl
from jax.experimental.pallas import tpu as pltpu

SIZES = (1, 2, 3, 6)          # pyramid pooling output sizes
EPS = 1e-5                    # BatchNorm2d eps (PyTorch default)


def _silu(x):
    return x * jax.nn.sigmoid(x)


# ----------------------------------------------------------------------------
# Host-side construction of the (exact) pooling / upsampling linear operators.
# ----------------------------------------------------------------------------
def _adaptive_pool_matrix(H, W, s):
    """P @ x_pixels == AdaptiveAvgPool2d(s)(x) flattened, exact PyTorch bins."""
    P = np.zeros((s * s, H * W), np.float32)
    for i in range(s):
        r0 = (i * H) // s
        r1 = -((-(i + 1) * H) // s)   # ceil
        for j in range(s):
            c0 = (j * W) // s
            c1 = -((-(j + 1) * W) // s)
            inv = 1.0 / ((r1 - r0) * (c1 - c0))
            for r in range(r0, r1):
                for c in range(c0, c1):
                    P[i * s + j, r * W + c] = inv
    return P


def _bilinear_matrix_1d(out_n, in_n):
    """align_corners=True bilinear interpolation weights, (out_n, in_n)."""
    M = np.zeros((out_n, in_n), np.float32)
    for o in range(out_n):
        src = o * (in_n - 1) / (out_n - 1) if out_n > 1 else 0.0
        i0 = min(int(np.floor(src)), in_n - 1)
        i1 = min(i0 + 1, in_n - 1)
        f = src - i0
        M[o, i0] += 1.0 - f
        M[o, i1] += f
    return M


def _upsample_matrix(H, W, s):
    Wh = _bilinear_matrix_1d(H, s)
    Ww = _bilinear_matrix_1d(W, s)
    return np.einsum("hi,wj->hwij", Wh, Ww).reshape(H * W, s * s).astype(np.float32)


def _build_pool_upsample(H, W):
    """Concatenate per-branch operators, padding each branch's pooled-bin span
    to a multiple of 8 so the concatenated pooled axis stays sublane aligned.
    Padded rows of P (and padded columns of U) are zero, so padded garbage
    never reaches the output."""
    HW = H * W
    spans, off = [], 0
    for s in SIZES:
        S = s * s
        Spad = ((S + 7) // 8) * 8
        spans.append((off, S, Spad))
        off += Spad
    total = off
    P = np.zeros((total, HW), np.float32)     # pooled = P @ x_pixels
    U = np.zeros((HW, total), np.float32)     # upsampled = U @ pooled
    for (o, S, _), s in zip(spans, SIZES):
        P[o:o + S, :] = _adaptive_pool_matrix(H, W, s)
        U[:, o:o + S] = _upsample_matrix(H, W, s)
    return P, U, tuple(spans), total


def _branch_mask(spans, Cint, S_total):
    """Block-diagonal (4*Cint, S_total) selector: branch i's channel rows see
    only its own (real, un-padded) pooled columns."""
    M = np.zeros((4 * Cint, S_total), np.float32)
    for i, (off, S, _) in enumerate(spans):
        M[i * Cint:(i + 1) * Cint, off:off + S] = 1.0
    return M


# ----------------------------------------------------------------------------
# Pallas kernels
# ----------------------------------------------------------------------------
def _pool_branch_kernel(x_ref, pt_ref, wb_ref, shift_ref, mask_ref, wout_ref,
                        wxt_ref, b_ref, xw_ref, h_ref, acc_ref):
    # x_ref    : (1, C, Thw)        one batch element, channels-first (lane=pixels)
    # pt_ref   : (Thw, S_total)     adaptive-pool operator slice (P^T)
    # wb_ref   : (4*Cint, C)        stacked BN-folded branch 1x1 conv weights (T)
    # shift_ref: (4*Cint, 1)        branch BN shifts
    # mask_ref : (4*Cint, S_total)  block-diagonal branch selector
    # wout_ref : (Cout, 4*Cint)     branch slice of folded output conv (T)
    # wxt_ref  : (Cout, C)          x slice of folded output conv (T)
    # b_ref    : (Cout, 1)          folded output BN shift
    # xw_ref   : (1, Cout, Thw)     OUT: per-tile x-part of the output conv (+bias)
    # h_ref    : (1, Cout, S_total) OUT: per-batch projected branch features
    # acc_ref  : (C, S_total) f32   scratch: pooled accumulator
    k = pl.program_id(1)

    @pl.when(k == 0)
    def _():
        acc_ref[...] = jnp.zeros_like(acc_ref)

    x = x_ref[0]                                               # (C, Thw)
    acc_ref[...] += jnp.dot(x, pt_ref[...],
                            preferred_element_type=jnp.float32)
    xw = jnp.dot(wxt_ref[...], x, preferred_element_type=jnp.float32)
    xw_ref[0] = (xw + b_ref[...]).astype(xw_ref.dtype)

    @pl.when(k == pl.num_programs(1) - 1)
    def _():
        pooled = acc_ref[...].astype(wb_ref.dtype)             # (C, S_total)
        g = jnp.dot(wb_ref[...], pooled,
                    preferred_element_type=jnp.float32)        # (4Cint, S_total)
        g = _silu(g + shift_ref[...]) * mask_ref[...]
        h = jnp.dot(wout_ref[...], g.astype(wout_ref.dtype),
                    preferred_element_type=jnp.float32)        # (Cout, S_total)
        h_ref[0] = h.astype(h_ref.dtype)


def _upsample_out_kernel(xw_ref, ut_ref, h_ref, o_ref):
    # xw_ref: (1, Cout, Thw)   ut_ref: (S_total, Thw)   h_ref: (1, Cout, S_total)
    up = jnp.dot(h_ref[0].astype(ut_ref.dtype), ut_ref[...],
                 preferred_element_type=jnp.float32)           # (Cout, Thw)
    o_ref[0] = _silu(xw_ref[0].astype(jnp.float32) + up).astype(o_ref.dtype)


# ----------------------------------------------------------------------------
# Wrapper
# ----------------------------------------------------------------------------
def _vmem_limit_bytes():
    try:
        cap = pltpu.get_tpu_info().vmem_capacity_bytes
        # generous on 128 MiB parts (v5e/v6e), conservative on 64 MiB (v7x)
        return int(min(cap * 3 // 4, 96 * 1024 * 1024))
    except Exception:
        return 32 * 1024 * 1024


def _pick_hw_tile(HW, C, Cout, S_total, elem_bytes, vmem_limit):
    """Largest 128-multiple spatial tile dividing HW that fits the VMEM budget
    (double-buffered streams); otherwise fall back to the full extent (lane dim
    must be a multiple of 128 or equal the full array dim)."""
    budget = vmem_limit // 2          # headroom for weights, acc, compiler temps
    for t in (2048, 1024, 512, 256, 128):
        if HW % t == 0:
            per_step = 2 * t * (C + S_total + 3 * Cout) * elem_bytes
            if per_step <= budget:
                return t
    return HW


def pyramid_pooling_forward(x_nchw, params, *, stream_dtype=jnp.float32):
    N, C, H, W = x_nchw.shape
    HW = H * W
    Cint = C // 4
    Cout = params["w_out"].shape[1]

    P_np, U_np, spans, S_total = _build_pool_upsample(H, W)
    pt = jnp.asarray(P_np.T).astype(stream_dtype)        # (HW, S_total)
    ut = jnp.asarray(U_np.T).astype(stream_dtype)        # (S_total, HW)
    mask = jnp.asarray(_branch_mask(spans, Cint, S_total))   # f32, tiny

    # Fold BatchNorm (running stats) into the 1x1 conv weights.
    sb = params["gb"] / jnp.sqrt(params["vb"] + EPS)                  # (4, Cint)
    wbT = jnp.transpose(params["wb"], (0, 2, 1)) * sb[:, :, None]     # (4,Cint,C)
    wbT = wbT.reshape(4 * Cint, C).astype(stream_dtype)
    shift = (params["bb"] - params["mb"] * sb).reshape(4 * Cint, 1)   # f32

    so = params["go"] / jnp.sqrt(params["vo"] + EPS)                  # (Cout,)
    w_out_f = params["w_out"] * so[None, :]                           # (2C, Cout)
    wxT = w_out_f[:C].T.astype(stream_dtype)                          # (Cout, C)
    woutT = w_out_f[C:].T.astype(stream_dtype)                        # (Cout, 4Cint)
    b_out = (params["bo"] - params["mo"] * so).reshape(Cout, 1)       # f32

    # NCHW view, channels-first, pixels on the lane axis. Pure reshape: no copy.
    x_rows = x_nchw.reshape(N, C, HW).astype(stream_dtype)

    elem = jnp.dtype(stream_dtype).itemsize
    vmem_limit = _vmem_limit_bytes()
    tile = _pick_hw_tile(HW, C, Cout, S_total, elem, vmem_limit)
    K = HW // tile

    # Kernel 1: single pass over x -- adaptive pooling (HW reduction into a VMEM
    # accumulator), fused branch ConvBnSiLU + projection through the branch
    # slice of the output conv, AND the x-slice of the output conv per tile.
    xw, h_all = pl.pallas_call(
        _pool_branch_kernel,
        out_shape=(jax.ShapeDtypeStruct((N, Cout, HW), stream_dtype),
                   jax.ShapeDtypeStruct((N, Cout, S_total), jnp.float32)),
        grid=(N, K),
        in_specs=[
            pl.BlockSpec((1, C, tile), lambda n, k: (n, 0, k)),
            pl.BlockSpec((tile, S_total), lambda n, k: (k, 0)),
            pl.BlockSpec((4 * Cint, C), lambda n, k: (0, 0)),
            pl.BlockSpec((4 * Cint, 1), lambda n, k: (0, 0)),
            pl.BlockSpec((4 * Cint, S_total), lambda n, k: (0, 0)),
            pl.BlockSpec((Cout, 4 * Cint), lambda n, k: (0, 0)),
            pl.BlockSpec((Cout, C), lambda n, k: (0, 0)),
            pl.BlockSpec((Cout, 1), lambda n, k: (0, 0)),
        ],
        out_specs=(
            pl.BlockSpec((1, Cout, tile), lambda n, k: (n, 0, k)),
            pl.BlockSpec((1, Cout, S_total), lambda n, k: (n, 0, 0)),
        ),
        scratch_shapes=[pltpu.VMEM((C, S_total), jnp.float32)],
        compiler_params=pltpu.CompilerParams(
            dimension_semantics=("parallel", "arbitrary"),
            vmem_limit_bytes=vmem_limit),
    )(x_rows, pt, wbT, shift, mask, woutT, wxT, b_out)

    # Kernel 2: fused [bilinear upsample + add x-part + SiLU] over spatial
    # tiles; only Cout-wide streams, both grid axes independent.
    out_rows = pl.pallas_call(
        _upsample_out_kernel,
        out_shape=jax.ShapeDtypeStruct((N, Cout, HW), jnp.float32),
        grid=(N, K),
        in_specs=[
            pl.BlockSpec((1, Cout, tile), lambda n, k: (n, 0, k)),
            pl.BlockSpec((S_total, tile), lambda n, k: (0, k)),
            pl.BlockSpec((1, Cout, S_total), lambda n, k: (n, 0, 0)),
        ],
        out_specs=pl.BlockSpec((1, Cout, tile), lambda n, k: (n, 0, k)),
        compiler_params=pltpu.CompilerParams(
            dimension_semantics=("parallel", "parallel"),
            vmem_limit_bytes=vmem_limit),
    )(xw, ut, h_all)

    # Output is already NCHW -- just un-flatten the spatial axis (no copy).
    return out_rows.reshape(N, Cout, H, W)


# ----------------------------------------------------------------------------
# Pure-JAX reference mirroring the PyTorch module (NCHW), for validation.
# ----------------------------------------------------------------------------
def reference_forward(x, params):
    N, C, H, W = x.shape
    hp = jax.lax.Precision.HIGHEST

    def conv1x1(y, w):  # w: (Cin, Cout) == torch weight (Cout,Cin,1,1) transposed
        return jnp.einsum("nchw,co->nohw", y, w, precision=hp)

    def bn(y, g, b, m, v):
        sc = g / jnp.sqrt(v + EPS)
        return y * sc[None, :, None, None] + (b - m * sc)[None, :, None, None]

    def adaptive_pool(y, s):   # test shapes have H, W divisible by every s
        assert H % s == 0 and W % s == 0
        return y.reshape(N, C, s, H // s, s, W // s).mean(axis=(3, 5))

    def upsample(y, s):        # bilinear, align_corners=True
        def idx(out_n):
            src = jnp.arange(out_n, dtype=jnp.float32) * (s - 1) / (out_n - 1)
            i0 = jnp.clip(jnp.floor(src).astype(jnp.int32), 0, s - 1)
            i1 = jnp.clip(i0 + 1, 0, s - 1)
            return i0, i1, src - i0.astype(jnp.float32)

        h0, h1, fh = idx(H)
        w0, w1, fw = idx(W)
        a = y[:, :, h0, :][:, :, :, w0]
        b = y[:, :, h0, :][:, :, :, w1]
        c = y[:, :, h1, :][:, :, :, w0]
        d = y[:, :, h1, :][:, :, :, w1]
        fw_ = fw[None, None, None, :]
        fh_ = fh[None, None, :, None]
        top = a * (1 - fw_) + b * fw_
        bot = c * (1 - fw_) + d * fw_
        return top * (1 - fh_) + bot * fh_

    feats = [x]
    for i, s in enumerate(SIZES):
        p = adaptive_pool(x, s)
        y = _silu(bn(conv1x1(p, params["wb"][i]),
                     params["gb"][i], params["bb"][i],
                     params["mb"][i], params["vb"][i]))
        feats.append(upsample(y, s))
    f = jnp.concatenate(feats, axis=1)
    return _silu(bn(conv1x1(f, params["w_out"]),
                    params["go"], params["bo"], params["mo"], params["vo"]))


# ----------------------------------------------------------------------------
if __name__ == "__main__":
    # Small shapes: N=2, in_channels=16 (inter=4), out_channels=8, H=W=12
    # (12 is divisible by all pyramid sizes 1/2/3/6).
    N, C, H, W = 2, 16, 12, 12
    Cout = 8
    Cint = C // 4

    key = jax.random.PRNGKey(0)
    ks = jax.random.split(key, 11)
    x = jax.random.normal(ks[0], (N, C, H, W), jnp.float32)

    # Deterministic synthetic parameters (conv weights stored as (Cin, Cout)).
    params = dict(
        wb=0.2 * jax.random.normal(ks[1], (4, C, Cint), jnp.float32),
        gb=1.0 + 0.1 * jax.random.normal(ks[2], (4, Cint), jnp.float32),
        bb=0.1 * jax.random.normal(ks[3], (4, Cint), jnp.float32),
        mb=0.1 * jax.random.normal(ks[4], (4, Cint), jnp.float32),
        vb=jax.random.uniform(ks[5], (4, Cint), jnp.float32, 0.5, 1.5),
        w_out=0.2 * jax.random.normal(ks[6], (2 * C, Cout), jnp.float32),
        go=1.0 + 0.1 * jax.random.normal(ks[7], (Cout,), jnp.float32),
        bo=0.1 * jax.random.normal(ks[8], (Cout,), jnp.float32),
        mo=0.1 * jax.random.normal(ks[9], (Cout,), jnp.float32),
        vo=jax.random.uniform(ks[10], (Cout,), jnp.float32, 0.5, 1.5),
    )

    ref = reference_forward(x, params)

    # f32 streaming path (tolerance only absorbs matmul-algorithm differences
    # between XLA reference and Mosaic; semantic bugs would be O(0.1+)).
    out_f32 = jax.block_until_ready(pyramid_pooling_forward(x, params))
    np.testing.assert_allclose(np.asarray(out_f32), np.asarray(ref),
                               rtol=1e-2, atol=1e-2)

    # bf16 streaming path (halves HBM traffic, f32 accumulation kept).
    out_bf16 = jax.block_until_ready(
        pyramid_pooling_forward(x, params, stream_dtype=jnp.bfloat16))
    np.testing.assert_allclose(np.asarray(out_bf16), np.asarray(ref),
                               rtol=5e-2, atol=5e-2)

    print("KERNEL_OK")
</pallas_src>

<mosaic_0001>
module attributes {stable_mosaic.version = 11 : i64} {
  func.func @_pool_branch_kernel(%arg0: i32, %arg1: i32, %arg2: memref<1x16x144xf32, #tpu.memory_space<vmem>>, %arg3: memref<144x72xf32, #tpu.memory_space<vmem>>, %arg4: memref<16x16xf32, #tpu.memory_space<vmem>>, %arg5: memref<16x1xf32, #tpu.memory_space<vmem>>, %arg6: memref<16x72xf32, #tpu.memory_space<vmem>>, %arg7: memref<8x16xf32, #tpu.memory_space<vmem>>, %arg8: memref<8x16xf32, #tpu.memory_space<vmem>>, %arg9: memref<8x1xf32, #tpu.memory_space<vmem>>, %arg10: memref<1x8x144xf32, #tpu.memory_space<vmem>>, %arg11: memref<1x8x72xf32, #tpu.memory_space<vmem>>, %arg12: memref<16x72xf32, #tpu.memory_space<vmem>>) attributes {dimension_semantics = [#tpu.dimension_semantics<parallel>, #tpu.dimension_semantics<arbitrary>], iteration_bounds = array<i64: 2, 1>, scalar_prefetch = 0 : i64, scratch_operands = 1 : i64, tpu.core_type = #tpu.core_type<tc>, window_params = [{transform_indices = @transform_0, window_bounds = array<i64: 1, 16, 144>}, {transform_indices = @transform_1, window_bounds = array<i64: 144, 72>}, {pipeline_mode = #tpu.pipeline_mode<synchronous>, transform_indices = @transform_2, window_bounds = array<i64: 16, 16>}, {pipeline_mode = #tpu.pipeline_mode<synchronous>, transform_indices = @transform_3, window_bounds = array<i64: 16, 1>}, {pipeline_mode = #tpu.pipeline_mode<synchronous>, transform_indices = @transform_4, window_bounds = array<i64: 16, 72>}, {pipeline_mode = #tpu.pipeline_mode<synchronous>, transform_indices = @transform_5, window_bounds = array<i64: 8, 16>}, {pipeline_mode = #tpu.pipeline_mode<synchronous>, transform_indices = @transform_6, window_bounds = array<i64: 8, 16>}, {pipeline_mode = #tpu.pipeline_mode<synchronous>, transform_indices = @transform_7, window_bounds = array<i64: 8, 1>}, {transform_indices = @transform_8, window_bounds = array<i64: 1, 8, 144>}, {transform_indices = @transform_9, window_bounds = array<i64: 1, 8, 72>}]} {
    %c0_i32 = arith.constant 0 : i32
    %0 = arith.cmpi eq, %arg1, %c0_i32 : i32
    %1 = arith.extui %0 : i1 to i32
    %c0_i32_0 = arith.constant 0 : i32
    %2 = arith.cmpi ne, %1, %c0_i32_0 : i32
    scf.if %2 {
      %cst_19 = arith.constant 0.000000e+00 : f32
      %21 = vector.broadcast %cst_19 : f32 to vector<16x72xf32>
      %c0_20 = arith.constant 0 : index
      %c0_21 = arith.constant 0 : index
      %22 = vector.load %arg12[%c0_20, %c0_21] : memref<16x72xf32, #tpu.memory_space<vmem>>, vector<16x72xf32>
      tpu.vector_store %arg12[%c0_20, %c0_21], %21 {strides = array<i32>} : memref<16x72xf32, #tpu.memory_space<vmem>>, vector<16x72xf32>,
    } else {
    }
    %c0 = arith.constant 0 : index
    %c0_1 = arith.constant 0 : index
    %c0_2 = arith.constant 0 : index
    %3 = vector.load %arg2[%c0, %c0_1, %c0_2] : memref<1x16x144xf32, #tpu.memory_space<vmem>>, vector<1x16x144xf32>
    %4 = vector.shape_cast %3 : vector<1x16x144xf32> to vector<16x144xf32>
    %c0_3 = arith.constant 0 : index
    %c0_4 = arith.constant 0 : index
    %5 = vector.load %arg12[%c0_3, %c0_4] : memref<16x72xf32, #tpu.memory_space<vmem>>, vector<16x72xf32>
    %c0_5 = arith.constant 0 : index
    %c0_6 = arith.constant 0 : index
    %6 = vector.load %arg3[%c0_5, %c0_6] : memref<144x72xf32, #tpu.memory_space<vmem>>, vector<144x72xf32>
    %cst = arith.constant dense<0.000000e+00> : vector<16x72xf32>
    %7 = tpu.matmul %4, %6, %cst {dimension_numbers = #tpu.dot_dimension_numbers<[1], [0], [0], [1], [0, 0, 1, 1], [], []>} : vector<16x144xf32>, vector<144x72xf32>, vector<16x72xf32> -> vector<16x72xf32>
    %8 = arith.addf %5, %7 : vector<16x72xf32>
    %c0_7 = arith.constant 0 : index
    %c0_8 = arith.constant 0 : index
    %9 = vector.load %arg12[%c0_7, %c0_8] : memref<16x72xf32, #tpu.memory_space<vmem>>, vector<16x72xf32>
    tpu.vector_store %arg12[%c0_7, %c0_8], %8 {strides = array<i32>} : memref<16x72xf32, #tpu.memory_space<vmem>>, vector<16x72xf32>,
    %c0_9 = arith.constant 0 : index
    %c0_10 = arith.constant 0 : index
    %10 = vector.load %arg8[%c0_9, %c0_10] : memref<8x16xf32, #tpu.memory_space<vmem>>, vector<8x16xf32>
    %cst_11 = arith.constant dense<0.000000e+00> : vector<8x144xf32>
    %11 = tpu.matmul %10, %4, %cst_11 {dimension_numbers = #tpu.dot_dimension_numbers<[1], [0], [0], [1], [0, 0, 1, 1], [], []>} : vector<8x16xf32>, vector<16x144xf32>, vector<8x144xf32> -> vector<8x144xf32>
    %c0_12 = arith.constant 0 : index
    %c0_13 = arith.constant 0 : index
    %12 = vector.load %arg9[%c0_12, %c0_13] : memref<8x1xf32, #tpu.memory_space<vmem>>, vector<8x1xf32>
    %13 = vector.broadcast %12 : vector<8x1xf32> to vector<8x144xf32>
    %14 = arith.addf %11, %13 : vector<8x144xf32>
    %c0_14 = arith.constant 0 : index
    %c0_15 = arith.constant 0 : index
    %c0_16 = arith.constant 0 : index
    %15 = vector.load %arg10[%c0_14, %c0_15, %c0_16] : memref<1x8x144xf32, #tpu.memory_space<vmem>>, vector<1x8x144xf32>
    %16 = vector.shape_cast %15 : vector<1x8x144xf32> to vector<8x144xf32>
    %17 = vector.shape_cast %14 : vector<8x144xf32> to vector<1x8x144xf32>
    tpu.vector_store %arg10[%c0_14, %c0_15, %c0_16], %17 {strides = array<i32>} : memref<1x8x144xf32, #tpu.memory_space<vmem>>, vector<1x8x144xf32>,
    %c0_i32_17 = arith.constant 0 : i32
    %18 = arith.cmpi eq, %arg1, %c0_i32_17 : i32
    %19 = arith.extui %18 : i1 to i32
    %c0_i32_18 = arith.constant 0 : i32
    %20 = arith.cmpi ne, %19, %c0_i32_18 : i32
    scf.if %20 {
      %c0_19 = arith.constant 0 : index
      %c0_20 = arith.constant 0 : index
      %21 = vector.load %arg12[%c0_19, %c0_20] : memref<16x72xf32, #tpu.memory_space<vmem>>, vector<16x72xf32>
      %c0_21 = arith.constant 0 : index
      %c0_22 = arith.constant 0 : index
      %22 = vector.load %arg4[%c0_21, %c0_22] : memref<16x16xf32, #tpu.memory_space<vmem>>, vector<16x16xf32>
      %cst_23 = arith.constant dense<0.000000e+00> : vector<16x72xf32>
      %23 = tpu.matmul %22, %21, %cst_23 {dimension_numbers = #tpu.dot_dimension_numbers<[1], [0], [0], [1], [0, 0, 1, 1], [], []>} : vector<16x16xf32>, vector<16x72xf32>, vector<16x72xf32> -> vector<16x72xf32>
      %c0_24 = arith.constant 0 : index
      %c0_25 = arith.constant 0 : index
      %24 = vector.load %arg5[%c0_24, %c0_25] : memref<16x1xf32, #tpu.memory_space<vmem>>, vector<16x1xf32>
      %25 = vector.broadcast %24 : vector<16x1xf32> to vector<16x72xf32>
      %26 = arith.addf %23, %25 : vector<16x72xf32>
      %27 = arith.negf %26 : vector<16x72xf32>
      %28 = math.exp %27 : vector<16x72xf32>
      %cst_26 = arith.constant 1.000000e+00 : f32
      %29 = vector.broadcast %cst_26 : f32 to vector<16x72xf32>
      %30 = arith.addf %29, %28 : vector<16x72xf32>
      %31 = arith.divf %29, %30 : vector<16x72xf32>
      %32 = arith.mulf %26, %31 : vector<16x72xf32>
      %c0_27 = arith.constant 0 : index
      %c0_28 = arith.constant 0 : index
      %33 = vector.load %arg6[%c0_27, %c0_28] : memref<16x72xf32, #tpu.memory_space<vmem>>, vector<16x72xf32>
      %34 = arith.mulf %32, %33 : vector<16x72xf32>
      %c0_29 = arith.constant 0 : index
      %c0_30 = arith.constant 0 : index
      %35 = vector.load %arg7[%c0_29, %c0_30] : memref<8x16xf32, #tpu.memory_space<vmem>>, vector<8x16xf32>
      %cst_31 = arith.constant dense<0.000000e+00> : vector<8x72xf32>
      %36 = tpu.matmul %35, %34, %cst_31 {dimension_numbers = #tpu.dot_dimension_numbers<[1], [0], [0], [1], [0, 0, 1, 1], [], []>} : vector<8x16xf32>, vector<16x72xf32>, vector<8x72xf32> -> vector<8x72xf32>
      %c0_32 = arith.constant 0 : index
      %c0_33 = arith.constant 0 : index
      %c0_34 = arith.constant 0 : index
      %37 = vector.load %arg11[%c0_32, %c0_33, %c0_34] : memref<1x8x72xf32, #tpu.memory_space<vmem>>, vector<1x8x72xf32>
      %38 = vector.shape_cast %37 : vector<1x8x72xf32> to vector<8x72xf32>
      %39 = vector.shape_cast %36 : vector<8x72xf32> to vector<1x8x72xf32>
      tpu.vector_store %arg11[%c0_32, %c0_33, %c0_34], %39 {strides = array<i32>} : memref<1x8x72xf32, #tpu.memory_space<vmem>>, vector<1x8x72xf32>,
    } else {
    }
    return
  }
  func.func @transform_0(%arg0: i32, %arg1: i32) -> (i32, i32, i32) {
    %c0_i32 = arith.constant 0 : i32
    %c0_i32_0 = arith.constant 0 : i32
    return %arg0, %c0_i32, %arg1 : i32, i32, i32
  }
  func.func @transform_1(%arg0: i32, %arg1: i32) -> (i32, i32) {
    %c0_i32 = arith.constant 0 : i32
    %c0_i32_0 = arith.constant 0 : i32
    return %arg1, %c0_i32 : i32, i32
  }
  func.func @transform_2(%arg0: i32, %arg1: i32) -> (i32, i32) {
    %c0_i32 = arith.constant 0 : i32
    %c0_i32_0 = arith.constant 0 : i32
    %c0_i32_1 = arith.constant 0 : i32
    return %c0_i32, %c0_i32_0 : i32, i32
  }
  func.func @transform_3(%arg0: i32, %arg1: i32) -> (i32, i32) {
    %c0_i32 = arith.constant 0 : i32
    %c0_i32_0 = arith.constant 0 : i32
    %c0_i32_1 = arith.constant 0 : i32
    return %c0_i32, %c0_i32_0 : i32, i32
  }
  func.func @transform_4(%arg0: i32, %arg1: i32) -> (i32, i32) {
    %c0_i32 = arith.constant 0 : i32
    %c0_i32_0 = arith.constant 0 : i32
    %c0_i32_1 = arith.constant 0 : i32
    return %c0_i32, %c0_i32_0 : i32, i32
  }
  func.func @transform_5(%arg0: i32, %arg1: i32) -> (i32, i32) {
    %c0_i32 = arith.constant 0 : i32
    %c0_i32_0 = arith.constant 0 : i32
    %c0_i32_1 = arith.constant 0 : i32
    return %c0_i32, %c0_i32_0 : i32, i32
  }
  func.func @transform_6(%arg0: i32, %arg1: i32) -> (i32, i32) {
    %c0_i32 = arith.constant 0 : i32
    %c0_i32_0 = arith.constant 0 : i32
    %c0_i32_1 = arith.constant 0 : i32
    return %c0_i32, %c0_i32_0 : i32, i32
  }
  func.func @transform_7(%arg0: i32, %arg1: i32) -> (i32, i32) {
    %c0_i32 = arith.constant 0 : i32
    %c0_i32_0 = arith.constant 0 : i32
    %c0_i32_1 = arith.constant 0 : i32
    return %c0_i32, %c0_i32_0 : i32, i32
  }
  func.func @transform_8(%arg0: i32, %arg1: i32) -> (i32, i32, i32) {
    %c0_i32 = arith.constant 0 : i32
    %c0_i32_0 = arith.constant 0 : i32
    return %arg0, %c0_i32, %arg1 : i32, i32, i32
  }
  func.func @transform_9(%arg0: i32, %arg1: i32) -> (i32, i32, i32) {
    %c0_i32 = arith.constant 0 : i32
    %c0_i32_0 = arith.constant 0 : i32
    %c0_i32_1 = arith.constant 0 : i32
    return %arg0, %c0_i32, %c0_i32_0 : i32, i32, i32
  }
}

</mosaic_0001>

<bundles_post_ra>
// kernel: tpu_custom_call.1
= control target key start
LH: loop header
LB: loop body
LE: loop exit
PB: predicated region body
PF: predicated region fallthrough
CT: control target
= control target key end

     0   :  { %s1695_s0 = inlined_call_operand.hbm [shape: f32[2,16,144], index: 0, kind: input, shape index: {}]   ;;  %s1696_s1 = inlined_call_operand.hbm [shape: f32[144,72], index: 1, kind: input, shape index: {}]   ;;  %s1697_s2 = inlined_call_operand.vmem [shape: f32[16,16], index: 2, kind: input, shape index: {}]   ;;  %s1698_s3 = inlined_call_operand.vmem [shape: f32[16,1], index: 3, kind: input, shape index: {}]   ;;  %s1699_s4 = inlined_call_operand.vmem [shape: f32[16,72], index: 4, kind: input, shape index: {}]   ;;  %s1700_s5 = inlined_call_operand.vmem [shape: f32[8,16], index: 5, kind: input, shape index: {}]   ;;  %s1701_s6 = inlined_call_operand.vmem [shape: f32[8,16], index: 6, kind: input, shape index: {}]   ;;  %s1702_s7 = inlined_call_operand.vmem [shape: f32[8,1], index: 7, kind: input, shape index: {}]   ;;  %s1703_s8 = inlined_call_operand.hbm [shape: f32[2,8,144], index: 8, kind: output, shape index: {0}]   ;;  %s1704_s9 = inlined_call_operand.hbm [shape: f32[2,8,72], index: 9, kind: output, shape index: {1}]  }
   0x1   :  { %1711 = sst [smem:[#allocation17_spill]] %s1696_s1 }
   0x2   :  { %15 = vsyncpa [#allocation4], 0 }
   0x3   :  { %17 = vsyncpa [#allocation4 + $0x1], 0 }
   0x4   :  { %18 = vsyncpa [#allocation7], 0 }
   0x5   :  { %19 = vsyncpa [#allocation5], 0 }
   0x6   :  { %21 = vsyncpa [#allocation5 + $0x1], 0 }
   0x7   :  { %22 = vsyncpa [#allocation10], 0 }
   0x8   :  { %24 = vsyncpa [#allocation10 + $0x1], 0  ;;  %s1388_s30 = smov 0   ;;  %s1390_s10 = smov 0  }
   0x9   :  { %s1392_s11 = smov 0   ;;  %s1394_s12 = smov 0  }
   0xa   :  { %s1396_s13 = smov 0   ;;  %s1398_s14 = smov 0  }
   0xb LB: > { %1712 = sst [smem:[#allocation15_spill]] %s1304_s30  ;;  %s963_s15 = sadd.s32 4294967295, %s1324_s14   ;;  %s1324_s14 = sphi %s1398_s14, %s30_s14   ;;  %s1320_s13 = sphi %s1396_s13, %s1736_s13   ;;  %s1316_s12 = sphi %s1394_s12, %s1735_s12   ;;  %s1312_s11 = sphi %s1392_s11, %s1734_s11   ;;  %s1308_s10 = sphi %s1390_s10, %s1733_s10   ;;  %s1304_s30 = sphi %s1388_s30, %s1732_s30  }
   0xc   : > { %s964_s16 = sadd.s32 4294967294, %s1324_s14   ;;  %p64_p0 = scmp.ne.s32.totalorder %s1308_s10, %s1304_s30 }
   0xd   : > { %p1422_p1 = scmp.eq.s32.totalorder %s963_s15, 0  ;;  %p1426_p2 = scmp.eq.s32.totalorder %s963_s15, 1 }
   0xe   : > { %p248_p3 = scmp.eq.s32.totalorder %s964_s16, 1  ;;  %p965_p5 = scmp.ge.s32.totalorder %s1324_s14, 1 }
   0xf   : > { %s1713_s17 = scalar_select %p1422_p1, 1, 0 }
  0x10   : > { %s1714_s18 = scalar_select %p1426_p2, 1, 0 }
  0x11   : > { %p1432_p4 = por %p1422_p1, %p64_p0  ;;  %p1437_p6 = por %p248_p3, %p64_p0 }
  0x12   : > { %p281_p7 = scmp.lt.s32.totalorder %s1324_s14, 3  ;;  %s1326_s22 = smov [#allocation6]  }
  0x13   : > { %s1715_s19 = scalar_select %p1432_p4, 1, 0 }
  0x14   : > { %s1716_s20 = scalar_select %p1437_p6, 1, 0 }
  0x15   : > { %p1442_p8 = pnand %p965_p5, %p281_p7  ;;  %s296_s23 = sshll.u32 %s1326_s22, 4  ;;  %s297_s23 = int_to_ptr.vmem [resolvable:$true] %s296_s23 }
  0x16   : > { %1717 = sst [smem:[#allocation16_spill]] %s1716_s20  ;;  %s42_s25 = sadd.s32 1, %s1320_s13 }
  0x17   : > { %s1718_s21 = scalar_select %p1442_p8, 1, 0 }
  0x18   : > { %p1062_p9 = pneg %p1442_p8  ;;  %s1720_s1 = sld [smem:[#allocation17_spill]] }
  0x1a   : > { %p1451_p11 = pnand %p1062_p9, %p1422_p1 }
  0x1c   : > { %p1150_p13 = pneg %p1451_p11 }
  0x1e   : > { %s1148_s28 = scalar_lea.hbm %s1720_s1, 2304 }
  0x1f   : > { %p1149_p12 = scmp.ne.s32.totalorder %s1720_s1, %s1148_s28  ;;  %p1155_p5 = scmp.lt.u32.totalorder %s1148_s28, %s1720_s1 }
  0x21   : > { %p1151_p0 = pnand %p1150_p13, %p1149_p12 }
  0x23   : > { %p1152_p3 = pneg %p1151_p0 }
  0x25   : > { %p1157_p7 = pnand %p1155_p5, %p1152_p3 }
  0x27   : > { %1160 = shalt.err (!%p1157_p7)
}
  0x28   : > { %s1161_s20 = scalar_lea.vmem %s297_s23, 2304  ;;  %p1169_p1 = scmp.lt.s32.totalorder %s297_s23, %s297_s23 }
  0x29   : > { %p1162_p9 = scmp.ne.s32.totalorder %s297_s23, %s1161_s20  ;;  %p1170_p4 = scmp.lt.s32.totalorder %s1161_s20, %s1161_s20 }
  0x2b   : > { %p1164_p10 = pnand %p1162_p9, %p1150_p13  ;;  %p1171_p8 = por %p1170_p4, %p1169_p1 }
  0x2d   : > { %p1165_p6 = pneg %p1164_p10 }
  0x2f   : > { %p1172_p2 = pnand %p1171_p8, %p1165_p6 }
  0x31   : > { %1175 = shalt.err (!%p1172_p2)
}
  0x32   : > { %s1327_s26 = smov 128   ;;  %s1328_s27 = smov 8  }
  0x33   : > { %1065 = dma.hbm_to_vmem [thread:$0]  (!%p1451_p11), %s1720_s1, 2304, %s297_s23, [#allocation7], %s1327_s26, %s1327_s26, %s1328_s27  }
  0x34   : > { %p44_p1 = scmp.ge.s32.totalorder %s42_s25, 2  ;;  %s51_s20 = sadd.s32 1, %s1312_s11 }
  0x35   : > { %p58_p2 = scmp.ne.s32.totalorder %s1312_s11, %s1308_s10  ;;  %p59_p4 = scmp.eq.s32.totalorder %s1324_s14, 0 }
  0x36   : > { %s1738_s25 = smov (%p44_p1, %s42_s25), 0  ;;  %p1722_p8 = scmp.ne.s32.totalorder %s1714_s18, 0 }
  0x37   : > { %p1478_p6 = por %p59_p4, %p58_p2  ;;  %s46_s24 = ssub.s32 %s1320_s13, %s1738_s25 }
  0x38   : > { %p1484_p10 = por %p1722_p8, %p58_p2  ;;  %p1078_p12 = scmp.lt.s32.totalorder %s1324_s14, 2 }
  0x39   : > { %p49_p11 = scmp.eq.s32.totalorder %s46_s24, 0  ;;  %s328_s23 = sand.u32 1, %s1312_s11  }
  0x3a   : > { %s968_s22 = sshll.u32 %s328_s23, 5  ;;  %s991_s27 = sshll.u32 %s1320_s13, 9 }
  0x3b   : > { %s1493_s26 = scalar_select %p49_p11, %s1312_s11, %s51_s20  }
  0x3c   : > { %s1499_s1 = scalar_lea.hbm %s1695_s0, %s991_s27  ;;  %s332_s18 = scalar_lea.vmem [#allocation3], %s968_s22 }
  0x3d   : > { %s341_s30 = sshll.u32 %s332_s18, 4  ;;  %p1505_p13 = pnand %p1078_p12, %p1478_p6  ;;  %s1501_s30 = int_to_ptr.vmem [resolvable:$true] %s341_s30 }
  0x3e   : > { %s1509_s20 = scalar_lea.sflag [#allocation4], %s328_s23  ;;  %s1176_s28 = scalar_lea.hbm %s1499_s1, 512 }
  0x3f   : > { %p1177_p0 = scmp.ne.s32.totalorder %s1499_s1, %s1176_s28  ;;  %p1178_p3 = pneg %p1505_p13 }
  0x40   : > { %s1181_s15 = scalar_lea.hbm %s1695_s0, 1024  ;;  %p1182_p9 = scmp.lt.u32.totalorder %s1499_s1, %s1695_s0 }
  0x41   : > { %p1179_p5 = pnand %p1178_p3, %p1177_p0  ;;  %p1183_p1 = scmp.lt.u32.totalorder %s1181_s15, %s1176_s28 }
  0x42   : > { %p1185_p4 = scmp.lt.u32.totalorder %s1176_s28, %s1499_s1 }
  0x43   : > { %p1180_p7 = pneg %p1179_p5  ;;  %p1184_p2 = por %p1183_p1, %p1182_p9 }
  0x45   : > { %p1186_p6 = por %p1185_p4, %p1184_p2 }
  0x47   : > { %p1187_p8 = pnand %p1186_p6, %p1180_p7 }
  0x49   : > { %1190 = shalt.err (!%p1187_p8)
}
  0x4a   : > { %s1191_s23 = scalar_lea.vmem %s1501_s30, 512  ;;  %s1329_s22 = smov [#allocation3]  }
  0x4b   : > { %p1192_p12 = scmp.ne.s32.totalorder %s1501_s30, %s1191_s23  ;;  %s1196_s27 = sshll.u32 %s1329_s22, 4  ;;  %s1197_s27 = int_to_ptr.vmem [resolvable:$false] %s1196_s27 }
  0x4c   : > { %s1198_s29 = scalar_lea.vmem %s1197_s27, 1024  ;;  %p1199_p5 = scmp.lt.s32.totalorder %s1501_s30, %s1197_s27 }
  0x4d   : > { %p1194_p11 = pnand %p1192_p12, %p1178_p3  ;;  %p1200_p9 = scmp.lt.s32.totalorder %s1198_s29, %s1191_s23 }
  0x4f   : > { %p1195_p0 = pneg %p1194_p11  ;;  %p1201_p1 = por %p1200_p9, %p1199_p5 }
  0x51   : > { %p1202_p2 = pnand %p1201_p1, %p1195_p0 }
  0x53   : > { %1205 = shalt.err (!%p1202_p2)
}
  0x54   : > { %s1330_s28 = smov 256   ;;  %s1331_s15 = smov 16  }
  0x55   : > { %1069 = dma.hbm_to_vmem [thread:$0]  (!%p1505_p13), %s1499_s1, 512, %s1501_s30, %s1509_s20, %s1330_s28, %s1330_s28, %s1331_s15  }
  0x56   : > { %p1725_p3 = scmp.ne.s32.totalorder %s1718_s21, 0 }
  0x57   : > { %s1540_s18 = sand.u32 (!%p1725_p3), 1, %s1308_s10   ;;  %p1726_p7 = scmp.ne.s32.totalorder (!%p1725_p3), %s1715_s19, 0 }
  0x58   : > { %353 = sbr.rel (%p1725_p3) target bundleno = 846 (0x34e), region = 52  ;;  %s972_s23 = sshll.u32 (!%p1725_p3), %s1540_s18, 5 }
  0x59   : > { %s356_s22 = scalar_lea.sflag (!%p1725_p3), [#allocation4], %s1540_s18  ;;  %s1544_s27 = scalar_lea.vmem (!%p1725_p3), [#allocation3], %s972_s23 }
  0x5f   : > { %1287 = dma.done.wait (%p1726_p7), %s356_s22, 512  }
  0x60   : > { %1289 = vsyncadd (%p1726_p7), %s356_s22, 4294966784  ;;  %p1727_p13 = scmp.ne.s32.totalorder %s1713_s17, 0 }
  0x62   : > { %1291 = dma.done.wait (%p1727_p13), [#allocation7], 2304  }
  0x63   : > { %1293 = vsyncadd (%p1727_p13), [#allocation7], 4294964992  ;;  %vm410_vm0 = vcmask 588800   ;;  %v1332_v0 = vmov 0.0|0.0   ;;  %v1333_v1 = vmov 0.0   ;;  %v419_v2 = vld [vmem:[#allocation6] sm:$0xff] }
  0x64   : > { %1014 = vmatprep.subr.bf16.mxu0 %v1332_v0  ;;  %411 = vst.msk [vmem:[#allocation2] sm:$0xff] %vm410_vm0, %v1333_v1  ;;  %412 = vst.msk [vmem:[#allocation2 + $0x8] sm:$0xff] %vm410_vm0, %v1333_v1  ;;  %598 = vmatprep.mubr.f32.mxu1 %v1333_v1  ;;  %v420_v3 = vld [vmem:[#allocation6 + $0x8] sm:$0xff]  ;;  %v421_v4 = vld [vmem:[#allocation6 + $0x10] sm:$0xff]  ;;  %vm437_vm1 = vcmask 130048   ;;  %v1334_v39 = vmov 0  }
  0x65   : > { %v1015_v5 = vpack.c.bf16 %v420_v3, %v419_v2  ;;  %v422_v6 = vld [vmem:[#allocation6 + $0x18] sm:$0xff]  ;;  %v423_v8 = vld [vmem:[#allocation6 + $0x20] sm:$0xff]  ;;  %v424_v9 = vld [vmem:[#allocation6 + $0x28] sm:$0xff]  ;;  %1138 = vset.pattern.permute.xlu0 %v1334_v39  ;;  %1139 = vset.pattern.permute.xlu1 %v1334_v39  ;;  %vm1335_vm2 = vmmov 0   ;;  %s992_s29 = sshll.u32 %s1316_s12, 8  ;;  %s1336_s17 = smov [#allocation8]  }
  0x66   : > { %v1018_v7 = vpack.c.bf16 %v422_v6, %v421_v4  ;;  %v414_v10 = vld [vmem:[%s1544_s27 + $0x8] sm:$0xff]  ;;  %v1021_v11 = vpack.c.bf16 %v424_v9, %v423_v8  ;;  %v425_v12 = vld [vmem:[#allocation6 + $0x30] sm:$0xff]  ;;  %v426_v13 = vld [vmem:[#allocation6 + $0x38] sm:$0xff]  ;;  %s1620_s22 = scalar_lea.hbm %s1703_s8, %s992_s29  ;;  %s1210_s19 = sshll.u32 %s1336_s17, 4  ;;  %s1211_s19 = int_to_ptr.vmem [resolvable:$false] %s1210_s19 }
  0x67   : > { %1016 = vmatpush1.bf16.msra.mxu0 %v1015_v5  ;;  %976 = vmatprep.mubr.msk.f32.mxu0 %vm437_vm1, %v414_v10  ;;  %v1024_v14 = vpack.c.bf16 %v426_v13, %v425_v12  ;;  %v427_v15 = vld [vmem:[#allocation6 + $0x40] sm:$0xff]  ;;  %v428_v16 = vld [vmem:[#allocation6 + $0x48] sm:$0xff]  ;;  %v429_v18 = vld [vmem:[#allocation6 + $0x50] sm:$0xff]  ;;  %s1212_s21 = scalar_lea.vmem %s1211_s19, 512 }
  0x68   : > { %1017 = vmatprep.subr.bf16.mxu0 %v1332_v0  ;;  %v1027_v17 = vpack.c.bf16 %v428_v16, %v427_v15  ;;  %v430_v19 = vld [vmem:[#allocation6 + $0x58] sm:$0xff]  ;;  %v431_v21 = vld [vmem:[#allocation6 + $0x60] sm:$0xff]  ;;  %v432_v22 = vld [vmem:[#allocation6 + $0x68] sm:$0xff] }
  0x69   : > { %v1030_v20 = vpack.c.bf16 %v430_v19, %v429_v18  ;;  %v1033_v23 = vpack.c.bf16 %v432_v22, %v431_v21  ;;  %v433_v24 = vld [vmem:[#allocation6 + $0x70] sm:$0xff]  ;;  %v434_v25 = vld [vmem:[#allocation6 + $0x78] sm:$0xff]  ;;  %v435_v27 = vld [vmem:[#allocation6 + $0x80] sm:$0xff] }
  0x6a   : > { %v1036_v26 = vpack.c.bf16 %v434_v25, %v433_v24  ;;  %v436_v28 = vld [vmem:[#allocation6 + $0x88] sm:$0xff]  ;;  %v413_v30 = vld [vmem:[%s1544_s27] sm:$0xff]  ;;  %v416_v31 = vld [vmem:[%s1544_s27 + $0x18] sm:$0xff] }
  0x6b   : > { %1019 = vmatpush1.bf16.msra.mxu0 %v1018_v7  ;;  %v1039_v29 = vpack.c.bf16 %v436_v28, %v435_v27  ;;  %v415_v32 = vld [vmem:[%s1544_s27 + $0x10] sm:$0xff]  ;;  %v1041_v33 = vpack.c.bf16 %v416_v31, %v414_v10  ;;  %v615_v40 = vld [vmem:[%s1698_s3 + $0x8] sm:$0xff]  ;;  %s974_s27 = sshll.u32 %s1540_s18, 4 }
  0x6c   : > { %1020 = vmatprep.subr.bf16.mxu0 %v1332_v0  ;;  %v1043_v34 = vpack.c.bf16 %v415_v32, %v413_v30  ;;  %v524_v35 = vld [vmem:[%s1701_s6] sm:$0xff]  ;;  %v418_v45 = vld [vmem:[#allocation2 + $0x8] sm:$0xff]  ;;  %s1599_s1 = scalar_lea.vmem [#allocation8], %s974_s27  ;;  %s801_s27 = scalar_lea.sflag [#allocation5], %s1540_s18 }
  0x6d   : > { %1042 = vmatprep.subr.bf16.mxu1 %v1041_v33  ;;  %v612_v36 = vld [vmem:[%s1697_s2] sm:$0xff]  ;;  %v613_v52 = vld [vmem:[%s1697_s2 + $0x8] sm:$0xff]  ;;  %s822_s28 = sshll.u32 %s1599_s1, 4  ;;  %s823_s28 = int_to_ptr.vmem [resolvable:$true] %s822_s28 }
  0x6e   : > { %1044 = vmatpush1.bf16.msra.mxu1 %v1043_v34  ;;  %v614_v37 = vld [vmem:[%s1698_s3] sm:$0xff]  ;;  %s1206_s30 = scalar_lea.vmem %s823_s28, 256  ;;  %p1213_p12 = scmp.lt.s32.totalorder %s823_s28, %s1211_s19 }
  0x6f   : > { %1022 = vmatpush1.bf16.msra.mxu0 %v1021_v11  ;;  %v525_v38 = vld [vmem:[%s1702_s7] sm:$0xff]  ;;  %618 = vperm.xlu0 %1138, %v614_v37   ;;  %p1207_p4 = scmp.ne.s32.totalorder %s823_s28, %s1206_s30  ;;  %p1214_p11 = scmp.lt.s32.totalorder %s1212_s21, %s1206_s30 }
  0x70   : > { %1023 = vmatprep.subr.bf16.mxu0 %v1332_v0  ;;  %528 = vperm.xlu1 %1139, %v525_v38   ;;  %v417_v41 = vld [vmem:[#allocation2] sm:$0xff] }
  0x71   : > { %978 = vmatmul.mubr.msk.f32.vlgmr.msra.gmra.mrb[0].mxu1 %vm437_vm1, %v524_v35  ;;  %v721_v10 = vld [vmem:[%s1699_s4] sm:$0xff]  ;;  %p1208_p6 = pnand %p1207_p4, %p1484_p10  ;;  %p1215_p0 = por %p1214_p11, %p1213_p12 }
  0x72   : > { %1004 = vmatprep.mubr.msk.f32.mxu1 %vm437_vm1, %v612_v36  ;;  %v725_v15 = vld [vmem:[%s1700_s5] sm:$0xff] }
  0x73   : > { %1025 = vmatpush1.bf16.msra.mxu0 %v1024_v14  ;;  %623 = vperm.xlu0 %1138, %v615_v40   ;;  %p1209_p8 = pneg %p1208_p6 }
  0x74   : > { %1026 = vmatprep.subr.bf16.mxu0 %v1332_v0 }
  0x75   : > { %p1216_p5 = pnand %p1215_p0, %p1209_p8 }
  0x77   : > { %1028 = vmatpush1.bf16.msra.mxu0 %v1027_v17 }
  0x78   : > { %1029 = vmatprep.subr.bf16.mxu0 %v1332_v0 }
  0x7b   : > { %1031 = vmatpush1.bf16.msra.mxu0 %v1030_v20 }
  0x7c   : > { %1032 = vmatprep.subr.bf16.mxu0 %v1332_v0 }
  0x7f   : > { %1034 = vmatpush1.bf16.msra.mxu0 %v1033_v23 }
  0x80   : > { %1035 = vmatprep.subr.bf16.mxu0 %v1332_v0 }
  0x83   : > { %1037 = vmatpush1.bf16.msra.mxu0 %v1036_v26 }
  0x84   : > { %1038 = vmatprep.subr.bf16.mxu0 %v1332_v0 }
  0x87   : > { %1040 = vmatpush1.bf16.msra.mxu0 %v1039_v29 }
  0x8a   : > { %509 = vmatmul.mubr.f32.vlgmr.msra.gmra.mrb[0].mxu0 %v413_v30 }
  0x8b   : > { %977 = vmatprep.mubr.msk.f32.mxu0 %vm437_vm1, %v416_v31 }
  0x8e   : > { %514 = vmatmul.mubr.f32.gmra.mrb[2].mxu0 %v415_v32 }
  0xee   : > { %v619_v58 = vpop.permute.xlu0 %618 }
  0xef   : > { %v529_v53 = vpop.permute.xlu1 %528 }
  0xf2   : > { %v624_v59 = vpop.permute.xlu0 %623 }
 0x144   : > { %v600_v54 = vpop.f32.mrb[0].mxu1 }
 0x145   : > { %v601_v55 = vadd.f32 %v600_v54, %v529_v53  ;;  %v602_v56 = vpop.f32.mrb[1].mxu1 }
 0x146   : > { %v603_v57 = vadd.f32 %v602_v56, %v529_v53 }
 0x147   : > { %605 = vst [vmem:[%s1599_s1] sm:$0xff] %v601_v55 }
 0x148   : > { %606 = vst.msk [vmem:[%s1599_s1 + $0x8] sm:$0xff] %vm437_vm1, %v603_v57 }
 0x15d   : > { %v510_v42 = vpop.f32.mrb[0].mxu0 }
 0x15e   : > { %v519_v43 = vadd.f32 %v510_v42, %v417_v41  ;;  %v512_v44 = vpop.f32.mrb[1].mxu0 }
 0x160   : > { %522 = vst.msk [vmem:[#allocation2] sm:$0xff] %vm410_vm0, %v519_v43 }
 0x161   : > { %v515_v46 = vpop.f32.mrb[2].mxu0 }
 0x162   : > { %v520_v47 = vadd.f32 %v515_v46, %v418_v45  ;;  %v517_v48 = vpop.f32.mrb[3].mxu0 }
 0x164   : > { %523 = vst.msk [vmem:[#allocation2 + $0x8] sm:$0xff] %vm410_vm0, %v520_v47 }
 0x167   : > { %v610_v49 = vld [vmem:[#allocation2] sm:$0xff] }
 0x16b   : > { %v611_v50 = vld [vmem:[#allocation2 + $0x8] sm:$0xff] }
 0x16c   : > { %v1045_v51 = vpack.c.bf16 %v611_v50, %v610_v49 }
 0x16e   : > { %1046 = vmatprep.subr.bf16.mxu1 %v1045_v51 }
 0x16f   : > { %1048 = vmatpush3.bf16.msra.mxu1 %v1045_v51 }
 0x170   : > { %1049 = vmatprep.subr.bf16.mxu1 %v1332_v0 }
 0x172   : > { %1005 = vmatmul.mubr.msk.f32.vlgmr.msra.gmra.mrb[2].mxu1 %vm437_vm1, %v613_v52 }
 0x173   : > { %1011 = vmatprep.mubr.msk.f32.mxu1 %vm1335_vm2, %v1333_v1  ;;  %v722_v1 = vld [vmem:[%s1699_s4 + $0x8] sm:$0xff] }
 0x245   : > { %v1006_v60 = vpop.f32.mrb[2].mxu1 }
 0x246   : > { %v704_v61 = vadd.f32 %v1006_v60, %v624_v59  ;;  %v698_v62 = vpop.f32.mrb[3].mxu1 }
 0x247   : > { %v699_v63 = vadd.f32 %v698_v62, %v619_v58 }
 0x248   : > { %v982_v0 = vmul.f32 -1.442695, %v704_v61 }
 0x249   : > { %v981_v2 = vmul.f32 -1.442695, %v699_v63 }
 0x24a   : > { %1140 = vpow2.f32 %v982_v0 }
 0x24b   : > { %1142 = vpow2.f32 %v981_v2 }
 0x254   : > { %v1141_v3 = vpop.eup %1140 }
 0x255   : > { %v1143_v4 = vpop.eup %1142  ;;  %v714_v5 = vadd.f32 1.0, %v1141_v3 }
 0x256   : > { %v713_v6 = vadd.f32 1.0, %v1143_v4 }
 0x257   : > { %1144 = vrcp.f32 %v714_v5 }
 0x258   : > { %1146 = vrcp.f32 %v713_v6 }
 0x261   : > { %v1145_v7 = vpop.eup %1144 }
 0x262   : > { %v1147_v8 = vpop.eup %1146  ;;  %v720_v9 = vmul.f32 %v1145_v7, %v704_v61 }
 0x263   : > { %v719_v11 = vmul.f32 %v1147_v8, %v699_v63 }
 0x264   : > { %v724_v12 = vmul.f32 %v722_v1, %v720_v9 }
 0x265   : > { %v723_v13 = vmul.f32 %v721_v10, %v719_v11 }
 0x267   : > { %v1050_v14 = vpack.c.bf16 %v724_v12, %v723_v13 }
 0x269   : > { %1051 = vmatpush3.bf16.msra.mxu1 %v1050_v14 }
 0x26c   : > { %1012 = vmatmul.mubr.msk.f32.vlgmr.msra.gmra.mrb[4].mxu1 %vm437_vm1, %v725_v15 }
 0x26d   : > { %1219 = shalt.err (!%p1216_p5)
}
 0x26e   : > { %s1220_s1 = scalar_lea.hbm %s1620_s22, 256  ;;  %s1224_s29 = scalar_lea.hbm %s1703_s8, 512 }
 0x26f   : > { %p1221_p9 = scmp.ne.s32.totalorder %s1620_s22, %s1220_s1  ;;  %p1225_p3 = scmp.lt.u32.totalorder %s1620_s22, %s1703_s8 }
 0x270   : > { %p1226_p7 = scmp.lt.u32.totalorder %s1224_s29, %s1220_s1  ;;  %p1228_p4 = scmp.lt.u32.totalorder %s1220_s1, %s1620_s22 }
 0x271   : > { %p1222_p1 = pnand %p1221_p9, %p1484_p10 }
 0x272   : > { %p1227_p13 = por %p1226_p7, %p1225_p3 }
 0x273   : > { %p1223_p2 = pneg %p1222_p1 }
 0x274   : > { %p1229_p6 = por %p1228_p4, %p1227_p13 }
 0x276   : > { %p1230_p8 = pnand %p1229_p6, %p1223_p2 }
 0x278   : > { %1233 = shalt.err (!%p1230_p8)
}
 0x279   : > { %1058 = dma.vmem_to_hbm [thread:$0]  (%p1484_p10), %s823_s28, 256, %s1620_s22, %s801_s27  }
 0x27a   : > { %s975_s30 = sshll.u32 %s1540_s18, 3  ;;  %s988_s17 = sshll.u32 %s1316_s12, 7 }
 0x27b   : > { %s402_s19 = scalar_lea.vmem [#allocation9], %s975_s30  ;;  %s1645_s29 = scalar_lea.hbm %s1704_s9, %s988_s17 }
 0x27c   : > { %s835_s21 = sshll.u32 %s402_s19, 4  ;;  %s806_s1 = scalar_lea.sflag [#allocation10], %s1540_s18  ;;  %s1647_s21 = int_to_ptr.vmem [resolvable:$true] %s835_s21 }
 0x27d   : > { %s1234_s28 = scalar_lea.vmem %s1647_s21, 128  ;;  %s1337_s12 = smov [#allocation9]  }
 0x27e   : > { %p1235_p12 = scmp.ne.s32.totalorder %s1647_s21, %s1234_s28  ;;  %s1238_s22 = sshll.u32 %s1337_s12, 4  ;;  %s1239_s22 = int_to_ptr.vmem [resolvable:$false] %s1238_s22 }
 0x27f   : > { %s1240_s27 = scalar_lea.vmem %s1239_s22, 256  ;;  %p1241_p5 = scmp.lt.s32.totalorder %s1647_s21, %s1239_s22 }
 0x280   : > { %p1236_p11 = pnand %p1235_p12, %p1484_p10  ;;  %p1242_p9 = scmp.lt.s32.totalorder %s1240_s27, %s1234_s28 }
 0x282   : > { %p1237_p0 = pneg %p1236_p11  ;;  %p1243_p1 = por %p1242_p9, %p1241_p5 }
 0x284   : > { %p1244_p2 = pnand %p1243_p1, %p1237_p0 }
 0x33f   : > { %v795_v16 = vpop.f32.mrb[4].mxu1 }
 0x340   : > { %799 = vst.msk [vmem:[%s402_s19] sm:$0xff] %vm410_vm0, %v795_v16  ;;  %v1013_v17 = vpop.f32.mrb[5].mxu1 }
 0x341   : > { %1247 = shalt.err (!%p1244_p2)
}
 0x342   : > { %s1248_s18 = scalar_lea.hbm %s1645_s29, 128  ;;  %s1252_s30 = scalar_lea.hbm %s1704_s9, 256 }
 0x343   : > { %p1249_p3 = scmp.ne.s32.totalorder %s1645_s29, %s1248_s18  ;;  %p1253_p4 = scmp.lt.u32.totalorder %s1645_s29, %s1704_s9 }
 0x344   : > { %p1254_p6 = scmp.lt.u32.totalorder %s1252_s30, %s1248_s18  ;;  %p1256_p12 = scmp.lt.u32.totalorder %s1248_s18, %s1645_s29 }
 0x345   : > { %p1250_p7 = pnand %p1249_p3, %p1484_p10 }
 0x346   : > { %p1255_p8 = por %p1254_p6, %p1253_p4 }
 0x347   : > { %p1251_p13 = pneg %p1250_p7 }
 0x348   : > { %p1257_p11 = por %p1256_p12, %p1255_p8 }
 0x34a   : > { %p1258_p0 = pnand %p1257_p11, %p1251_p13 }
 0x34c   : > { %1261 = shalt.err (!%p1258_p0)
}
 0x34d   : > { %1059 = dma.vmem_to_hbm [thread:$0]  (%p1484_p10), %s1647_s21, 128, %s1645_s29, %s806_s1  }
 0x34e PF: > { %s1728_s24 = sld [smem:[#allocation15_spill]]  ;;  %s1729_s20 = sld [smem:[#allocation16_spill]] }
 0x34f   : > { %p1731_p9 = scmp.ge.s32.totalorder %s1324_s14, 2 }
 0x354   : > { %s847_s28 = sand.u32 1, %s1728_s24   ;;  %p1730_p5 = scmp.ne.s32.totalorder %s1729_s20, 0 }
 0x355   : > { %s848_s12 = scalar_lea.sflag [#allocation5], %s847_s28 }
 0x356   : > { %p1071_p1 = pnand %p1731_p9, %p1730_p5 }
 0x358   : > { %1295 = dma.done.wait (!%p1071_p1), %s848_s12, 256  }
 0x359   : > { %1297 = vsyncadd (!%p1071_p1), %s848_s12, 4294967040  ;;  %s857_s22 = scalar_lea.sflag [#allocation10], %s847_s28 }
 0x35a   : > { %1299 = dma.done.wait (!%p1071_p1), %s857_s22, 128  }
 0x35b   : > { %1301 = vsyncadd (!%p1071_p1), %s857_s22, 4294967168  ;;  %s30_s14 = sadd.s32 1, %s1324_s14   ;;  %s1732_s30 = smov %s1308_s10 }
 0x35c   : > { %p27_p2 = scmp.ge.s32.totalorder %s30_s14, 4   ;;  %s1733_s10 = smov %s1312_s11 }
 0x35d   : > { %s1734_s11 = smov %s1493_s26  ;;  %s1735_s12 = smov %s1320_s13 }
 0x35e   : > { %s1736_s13 = smov %s1738_s25  ;;  %29 = sbr.rel (!%p27_p2) target bundleno = 11 (0xb), region = 127 }
 0x365   :  { %862 = vsyncpa [#allocation4], 1 }
 0x366   :  { %864 = vsyncpa [#allocation4 + $0x1], 1 }
 0x367   :  { %865 = vsyncpa [#allocation7], 1 }
 0x368   :  { %866 = vsyncpa [#allocation5], 1 }
 0x369   :  { %868 = vsyncpa [#allocation5 + $0x1], 1 }
 0x36a   :  { %869 = vsyncpa [#allocation10], 1 }
 0x36b   :  { %871 = vsyncpa [#allocation10 + $0x1], 1 }

</bundles_post_ra>
